<compile_context>
chip_gen: v7x
topology: tpu7x:2x2x1
jax: 0.10.0
libtpu: 0.0.40
codegen_flags: <defaults>
</compile_context>

<pallas_src>
import functools

import jax
import jax.numpy as jnp
from jax import lax
from jax.experimental import pallas as pl
from jax.experimental.pallas import tpu as pltpu

LN_EPS = 1e-5                 # torch.nn.LayerNorm default eps
_SQRT_HALF = 0.7071067811865476


def _round_up(n, m):
    return ((n + m - 1) // m) * m


def _pad_to(a, shape):
    pads = [(0, t - s) for s, t in zip(a.shape, shape)]
    if all(p == (0, 0) for p in pads):
        return a
    return jnp.pad(a, pads)


def _gelu_exact(x):
    # PyTorch F.gelu default == exact erf formulation.
    # (tanh-approx would use the otherwise-idle EUP slot but changes numerics.)
    return 0.5 * x * (1.0 + lax.erf(x * _SQRT_HALF))


def _layernorm(x, w, b, n_true):
    # Single-pass LN: one read of x gives both E[x] and E[x^2].  Dividing by the
    # true (unpadded) width keeps zero-padded lanes exactly zero.
    inv_n = 1.0 / n_true
    mu = jnp.sum(x, axis=-1, keepdims=True) * inv_n
    ex2 = jnp.sum(x * x, axis=-1, keepdims=True) * inv_n
    var = ex2 - mu * mu
    return (x - mu) * lax.rsqrt(var + LN_EPS) * w + b


def gmlp_stack_kernel(x_ref, ln1w_ref, ln1b_ref, w1u_ref, b1u_ref, w1v_ref,
                      b1v_ref, ln2w_ref, ln2b_ref, spw_ref, spb_ref, w2_ref,
                      b2_ref, out_ref, acc_ref, *, f_true, h_true):
    li = pl.program_id(1)

    # Load the input activation into the resident f32 accumulator at layer 0.
    @pl.when(li == 0)
    def _():
        acc_ref[...] = x_ref[...].astype(jnp.float32)

    bb, t, fp = acc_ref.shape
    hp = w1u_ref.shape[-1]
    m = bb * t

    x3 = acc_ref[...]                                   # (Bb, T, Fp) f32
    x = x3.reshape(m, fp)                               # fold batch into MXU M dim

    # --- gMLPBlock: LayerNorm(features) -> channel_proj1 -> GELU -------------
    xn = _layernorm(x, ln1w_ref[0], ln1b_ref[0], f_true)
    u = _gelu_exact(jnp.dot(xn, w1u_ref[0],
                            preferred_element_type=jnp.float32) + b1u_ref[0])
    v = _gelu_exact(jnp.dot(xn, w1v_ref[0],
                            preferred_element_type=jnp.float32) + b1v_ref[0])

    # --- SpatialGatingUnit: LayerNorm(hidden) -> Conv1d(T, T, 1) -> gate -----
    v = _layernorm(v, ln2w_ref[0], ln2b_ref[0], h_true)
    v3 = v.reshape(bb, t, hp)
    spw = jnp.broadcast_to(spw_ref[...], (bb, t, t))    # (Bb, T, T)
    vm = jnp.einsum("bst,bth->bsh", spw, v3,
                    preferred_element_type=jnp.float32) + spb_ref[...]
    g = u * vm.reshape(m, hp)

    # --- channel_proj2 + residual --------------------------------------------
    y = jnp.dot(g, w2_ref[0], preferred_element_type=jnp.float32) + b2_ref[0]
    acc_ref[...] = x3 + y.reshape(bb, t, fp)

    @pl.when(li == pl.num_programs(1) - 1)
    def _():
        out_ref[...] = acc_ref[...].astype(out_ref.dtype)


def gmlp_forward(x, params, hidden, *, block_batch=None):
    """Run the full gMLP stack in one Pallas call.

    Grid = (batch_tiles [parallel], layers [arbitrary]); activation stays in a
    VMEM scratch across the layer axis.  Feature/hidden axes are padded to 128
    lanes (exact thanks to true-width LayerNorm divisors).
    # TODO(synk): for very large F/H/T (v7x 64 MiB VMEM) add K/token tiling of
    # w1/w2/sp_w with an accumulator instead of keeping whole weights resident.
    """
    B, T, F = x.shape
    L = len(params)
    H = hidden
    Fp = _round_up(F, 128)
    Hp = _round_up(H, 128)

    if block_batch is None:
        bb = max(1, min(B, max(1, 256 // max(T, 1))))   # target ~256 rows per tile
        while B % bb:
            bb -= 1
        block_batch = bb
    assert B % block_batch == 0
    nb = B // block_batch

    # --- repack params: split channel_proj1 into u/v halves, pad lanes, stack L.
    def pack(p):
        b1 = p["b1"].reshape(-1)
        return dict(
            ln1_w=_pad_to(p["ln1_w"].reshape(1, F), (1, Fp)),
            ln1_b=_pad_to(p["ln1_b"].reshape(1, F), (1, Fp)),
            w1u=_pad_to(p["w1"][:, :H], (Fp, Hp)),
            b1u=_pad_to(b1[:H].reshape(1, H), (1, Hp)),
            w1v=_pad_to(p["w1"][:, H:], (Fp, Hp)),
            b1v=_pad_to(b1[H:].reshape(1, H), (1, Hp)),
            ln2_w=_pad_to(p["ln2_w"].reshape(1, H), (1, Hp)),
            ln2_b=_pad_to(p["ln2_b"].reshape(1, H), (1, Hp)),
            sp_w=p["sp_w"],
            sp_b=p["sp_b"].reshape(T, 1),
            w2=_pad_to(p["w2"], (Hp, Fp)),
            b2=_pad_to(p["b2"].reshape(1, F), (1, Fp)),
        )

    names = ["ln1_w", "ln1_b", "w1u", "b1u", "w1v", "b1v",
             "ln2_w", "ln2_b", "sp_w", "sp_b", "w2", "b2"]
    packed = [pack(p) for p in params]
    weights = [jnp.stack([pp[k] for pp in packed], axis=0) for k in names]

    xp = _pad_to(x, (B, T, Fp))

    x_index = lambda bi, li: (bi, 0, 0)     # activation tile per batch-tile
    w_index = lambda bi, li: (li, 0, 0)     # weight slice per layer (prefetched)

    in_specs = [pl.BlockSpec((block_batch, T, Fp), x_index)]
    in_specs += [pl.BlockSpec((1,) + w.shape[1:], w_index) for w in weights]

    out = pl.pallas_call(
        functools.partial(gmlp_stack_kernel, f_true=F, h_true=H),
        out_shape=jax.ShapeDtypeStruct((B, T, Fp), x.dtype),
        grid_spec=pltpu.PrefetchScalarGridSpec(
            num_scalar_prefetch=0,
            grid=(nb, L),
            in_specs=in_specs,
            out_specs=pl.BlockSpec((block_batch, T, Fp), x_index),
            scratch_shapes=[pltpu.VMEM((block_batch, T, Fp), jnp.float32)],
        ),
        compiler_params=pltpu.CompilerParams(
            dimension_semantics=("parallel", "arbitrary")),
    )(xp, *weights)
    return out[..., :F]


def init_params(key, features, tokens, expand=2, num_layers=4):
    hidden = features * expand
    params = []
    for i in range(num_layers):
        k = jax.random.fold_in(key, i)
        k1, k2, k3, k4, k5 = jax.random.split(k, 5)
        params.append(dict(
            # nn.LayerNorm default init: weight=1, bias=0
            ln1_w=jnp.ones((1, features), jnp.float32),
            ln1_b=jnp.zeros((1, features), jnp.float32),
            # channel_proj1: Linear(features, 2*hidden)  (stored as (F, 2H) for x @ W)
            w1=jax.random.normal(k1, (features, 2 * hidden), jnp.float32) * 0.05,
            b1=jax.random.normal(k2, (1, 2 * hidden), jnp.float32) * 0.05,
            # SGU LayerNorm(hidden)
            ln2_w=jnp.ones((1, hidden), jnp.float32),
            ln2_b=jnp.zeros((1, hidden), jnp.float32),
            # spatial_proj: Conv1d(tokens, tokens, 1) -> (T, T) matrix
            sp_w=jax.random.normal(k3, (tokens, tokens), jnp.float32) * 0.05,
            # nn.init.constant_(self.spatial_proj.bias, 1.0)
            sp_b=jnp.ones((tokens, 1), jnp.float32),
            # channel_proj2: Linear(hidden, features)
            w2=jax.random.normal(k4, (hidden, features), jnp.float32) * 0.05,
            b2=jax.random.normal(k5, (1, features), jnp.float32) * 0.05,
        ))
    return params, hidden


def _layernorm_ref(x, w, b):
    mu = jnp.mean(x, axis=-1, keepdims=True)
    var = jnp.mean(jnp.square(x - mu), axis=-1, keepdims=True)
    return (x - mu) * lax.rsqrt(var + LN_EPS) * w + b


def gmlp_reference(x, params, hidden):
    """Plain-JAX reference mirroring the PyTorch forward exactly."""
    for p in params:
        residual = x
        h = _layernorm_ref(x, p["ln1_w"], p["ln1_b"])
        h = _gelu_exact(jnp.einsum("btf,fh->bth", h, p["w1"]) + p["b1"])
        u, v = h[..., :hidden], h[..., hidden:]
        v = _layernorm_ref(v, p["ln2_w"], p["ln2_b"])
        v = jnp.einsum("st,bth->bsh", p["sp_w"], v) + p["sp_b"][None]
        g = u * v
        x = jnp.einsum("bth,hf->btf", g, p["w2"]) + p["b2"] + residual
    return x


if __name__ == "__main__":
    key = jax.random.PRNGKey(0)
    B, T, F = 2, 8, 32                      # batch, tokens, features
    params, hidden = init_params(jax.random.fold_in(key, 1), F, T,
                                 expand=2, num_layers=4)
    x = jax.random.normal(key, (B, T, F), jnp.float32)

    y = gmlp_forward(x, params, hidden)
    jax.block_until_ready(y)

    y_ref = gmlp_reference(x, params, hidden)
    assert y.shape == y_ref.shape
    assert jnp.allclose(y, y_ref, rtol=1e-3, atol=1e-4), "mismatch vs reference"
    print("KERNEL_OK")
</pallas_src>

<mosaic_0001>
module attributes {stable_mosaic.version = 11 : i64} {
  func.func @gmlp_stack_kernel(%arg0: i32, %arg1: i32, %arg2: memref<2x8x128xf32, #tpu.memory_space<vmem>>, %arg3: memref<1x1x128xf32, #tpu.memory_space<vmem>>, %arg4: memref<1x1x128xf32, #tpu.memory_space<vmem>>, %arg5: memref<1x128x128xf32, #tpu.memory_space<vmem>>, %arg6: memref<1x1x128xf32, #tpu.memory_space<vmem>>, %arg7: memref<1x128x128xf32, #tpu.memory_space<vmem>>, %arg8: memref<1x1x128xf32, #tpu.memory_space<vmem>>, %arg9: memref<1x1x128xf32, #tpu.memory_space<vmem>>, %arg10: memref<1x1x128xf32, #tpu.memory_space<vmem>>, %arg11: memref<1x8x8xf32, #tpu.memory_space<vmem>>, %arg12: memref<1x8x1xf32, #tpu.memory_space<vmem>>, %arg13: memref<1x128x128xf32, #tpu.memory_space<vmem>>, %arg14: memref<1x1x128xf32, #tpu.memory_space<vmem>>, %arg15: memref<2x8x128xf32, #tpu.memory_space<vmem>>, %arg16: memref<2x8x128xf32, #tpu.memory_space<vmem>>) attributes {dimension_semantics = [#tpu.dimension_semantics<parallel>, #tpu.dimension_semantics<arbitrary>], iteration_bounds = array<i64: 1, 4>, scalar_prefetch = 0 : i64, scratch_operands = 1 : i64, tpu.core_type = #tpu.core_type<tc>, window_params = [{transform_indices = @transform_0, window_bounds = array<i64: 2, 8, 128>}, {transform_indices = @transform_1, window_bounds = array<i64: 1, 1, 128>}, {transform_indices = @transform_2, window_bounds = array<i64: 1, 1, 128>}, {transform_indices = @transform_3, window_bounds = array<i64: 1, 128, 128>}, {transform_indices = @transform_4, window_bounds = array<i64: 1, 1, 128>}, {transform_indices = @transform_5, window_bounds = array<i64: 1, 128, 128>}, {transform_indices = @transform_6, window_bounds = array<i64: 1, 1, 128>}, {transform_indices = @transform_7, window_bounds = array<i64: 1, 1, 128>}, {transform_indices = @transform_8, window_bounds = array<i64: 1, 1, 128>}, {transform_indices = @transform_9, window_bounds = array<i64: 1, 8, 8>}, {transform_indices = @transform_10, window_bounds = array<i64: 1, 8, 1>}, {transform_indices = @transform_11, window_bounds = array<i64: 1, 128, 128>}, {transform_indices = @transform_12, window_bounds = array<i64: 1, 1, 128>}, {transform_indices = @transform_13, window_bounds = array<i64: 2, 8, 128>}]} {
    %c0_i32 = arith.constant 0 : i32
    %0 = arith.cmpi eq, %arg1, %c0_i32 : i32
    %1 = arith.extui %0 : i1 to i32
    %c0_i32_0 = arith.constant 0 : i32
    %2 = arith.cmpi ne, %1, %c0_i32_0 : i32
    scf.if %2 {
      %c0_62 = arith.constant 0 : index
      %c0_63 = arith.constant 0 : index
      %c0_64 = arith.constant 0 : index
      %110 = vector.load %arg2[%c0_62, %c0_63, %c0_64] : memref<2x8x128xf32, #tpu.memory_space<vmem>>, vector<2x8x128xf32>
      %c0_65 = arith.constant 0 : index
      %c0_66 = arith.constant 0 : index
      %c0_67 = arith.constant 0 : index
      %111 = vector.load %arg16[%c0_65, %c0_66, %c0_67] : memref<2x8x128xf32, #tpu.memory_space<vmem>>, vector<2x8x128xf32>
      tpu.vector_store %arg16[%c0_65, %c0_66, %c0_67], %110 {strides = array<i32>} : memref<2x8x128xf32, #tpu.memory_space<vmem>>, vector<2x8x128xf32>,
    } else {
    }
    %c0 = arith.constant 0 : index
    %c0_1 = arith.constant 0 : index
    %c0_2 = arith.constant 0 : index
    %3 = vector.load %arg16[%c0, %c0_1, %c0_2] : memref<2x8x128xf32, #tpu.memory_space<vmem>>, vector<2x8x128xf32>
    %4 = vector.shape_cast %3 : vector<2x8x128xf32> to vector<16x128xf32>
    %c0_3 = arith.constant 0 : index
    %c0_4 = arith.constant 0 : index
    %c0_5 = arith.constant 0 : index
    %5 = vector.load %arg3[%c0_3, %c0_4, %c0_5] : memref<1x1x128xf32, #tpu.memory_space<vmem>>, vector<1x1x128xf32>
    %6 = vector.shape_cast %5 : vector<1x1x128xf32> to vector<1x128xf32>
    %c0_6 = arith.constant 0 : index
    %c0_7 = arith.constant 0 : index
    %c0_8 = arith.constant 0 : index
    %7 = vector.load %arg4[%c0_6, %c0_7, %c0_8] : memref<1x1x128xf32, #tpu.memory_space<vmem>>, vector<1x1x128xf32>
    %8 = vector.shape_cast %7 : vector<1x1x128xf32> to vector<1x128xf32>
    %cst = arith.constant dense<0.000000e+00> : vector<16xf32>
    %9 = vector.multi_reduction <add>, %4, %cst [1] : vector<16x128xf32> to vector<16xf32>
    %10 = vector.shape_cast %9 : vector<16xf32> to vector<16x1xf32>
    %cst_9 = arith.constant 3.125000e-02 : f32
    %11 = vector.broadcast %cst_9 : f32 to vector<16x1xf32>
    %12 = arith.mulf %10, %11 : vector<16x1xf32>
    %13 = arith.mulf %4, %4 : vector<16x128xf32>
    %cst_10 = arith.constant dense<0.000000e+00> : vector<16xf32>
    %14 = vector.multi_reduction <add>, %13, %cst_10 [1] : vector<16x128xf32> to vector<16xf32>
    %15 = vector.shape_cast %14 : vector<16xf32> to vector<16x1xf32>
    %cst_11 = arith.constant 3.125000e-02 : f32
    %16 = vector.broadcast %cst_11 : f32 to vector<16x1xf32>
    %17 = arith.mulf %15, %16 : vector<16x1xf32>
    %18 = arith.mulf %12, %12 : vector<16x1xf32>
    %19 = arith.subf %17, %18 : vector<16x1xf32>
    %20 = vector.broadcast %12 : vector<16x1xf32> to vector<16x128xf32>
    %21 = arith.subf %4, %20 : vector<16x128xf32>
    %cst_12 = arith.constant 9.99999974E-6 : f32
    %22 = vector.broadcast %cst_12 : f32 to vector<16x1xf32>
    %23 = arith.addf %19, %22 : vector<16x1xf32>
    %24 = math.rsqrt %23 : vector<16x1xf32>
    %25 = vector.broadcast %24 : vector<16x1xf32> to vector<16x128xf32>
    %26 = arith.mulf %21, %25 : vector<16x128xf32>
    %27 = vector.broadcast %6 : vector<1x128xf32> to vector<16x128xf32>
    %28 = arith.mulf %26, %27 : vector<16x128xf32>
    %29 = vector.broadcast %8 : vector<1x128xf32> to vector<16x128xf32>
    %30 = arith.addf %28, %29 : vector<16x128xf32>
    %c0_13 = arith.constant 0 : index
    %c0_14 = arith.constant 0 : index
    %c0_15 = arith.constant 0 : index
    %31 = vector.load %arg5[%c0_13, %c0_14, %c0_15] : memref<1x128x128xf32, #tpu.memory_space<vmem>>, vector<1x128x128xf32>
    %32 = vector.shape_cast %31 : vector<1x128x128xf32> to vector<128x128xf32>
    %cst_16 = arith.constant dense<0.000000e+00> : vector<16x128xf32>
    %33 = tpu.matmul %30, %32, %cst_16 {dimension_numbers = #tpu.dot_dimension_numbers<[1], [0], [0], [1], [0, 0, 1, 1], [], []>} : vector<16x128xf32>, vector<128x128xf32>, vector<16x128xf32> -> vector<16x128xf32>
    %c0_17 = arith.constant 0 : index
    %c0_18 = arith.constant 0 : index
    %c0_19 = arith.constant 0 : index
    %34 = vector.load %arg6[%c0_17, %c0_18, %c0_19] : memref<1x1x128xf32, #tpu.memory_space<vmem>>, vector<1x1x128xf32>
    %35 = vector.shape_cast %34 : vector<1x1x128xf32> to vector<1x128xf32>
    %36 = vector.broadcast %35 : vector<1x128xf32> to vector<16x128xf32>
    %37 = arith.addf %33, %36 : vector<16x128xf32>
    %cst_20 = arith.constant 5.000000e-01 : f32
    %38 = vector.broadcast %cst_20 : f32 to vector<16x128xf32>
    %39 = arith.mulf %38, %37 : vector<16x128xf32>
    %cst_21 = arith.constant 0.707106769 : f32
    %40 = vector.broadcast %cst_21 : f32 to vector<16x128xf32>
    %41 = arith.mulf %37, %40 : vector<16x128xf32>
    %42 = math.erf %41 : vector<16x128xf32>
    %cst_22 = arith.constant 1.000000e+00 : f32
    %43 = vector.broadcast %cst_22 : f32 to vector<16x128xf32>
    %44 = arith.addf %43, %42 : vector<16x128xf32>
    %45 = arith.mulf %39, %44 : vector<16x128xf32>
    %c0_23 = arith.constant 0 : index
    %c0_24 = arith.constant 0 : index
    %c0_25 = arith.constant 0 : index
    %46 = vector.load %arg7[%c0_23, %c0_24, %c0_25] : memref<1x128x128xf32, #tpu.memory_space<vmem>>, vector<1x128x128xf32>
    %47 = vector.shape_cast %46 : vector<1x128x128xf32> to vector<128x128xf32>
    %cst_26 = arith.constant dense<0.000000e+00> : vector<16x128xf32>
    %48 = tpu.matmul %30, %47, %cst_26 {dimension_numbers = #tpu.dot_dimension_numbers<[1], [0], [0], [1], [0, 0, 1, 1], [], []>} : vector<16x128xf32>, vector<128x128xf32>, vector<16x128xf32> -> vector<16x128xf32>
    %c0_27 = arith.constant 0 : index
    %c0_28 = arith.constant 0 : index
    %c0_29 = arith.constant 0 : index
    %49 = vector.load %arg8[%c0_27, %c0_28, %c0_29] : memref<1x1x128xf32, #tpu.memory_space<vmem>>, vector<1x1x128xf32>
    %50 = vector.shape_cast %49 : vector<1x1x128xf32> to vector<1x128xf32>
    %51 = vector.broadcast %50 : vector<1x128xf32> to vector<16x128xf32>
    %52 = arith.addf %48, %51 : vector<16x128xf32>
    %cst_30 = arith.constant 5.000000e-01 : f32
    %53 = vector.broadcast %cst_30 : f32 to vector<16x128xf32>
    %54 = arith.mulf %53, %52 : vector<16x128xf32>
    %cst_31 = arith.constant 0.707106769 : f32
    %55 = vector.broadcast %cst_31 : f32 to vector<16x128xf32>
    %56 = arith.mulf %52, %55 : vector<16x128xf32>
    %57 = math.erf %56 : vector<16x128xf32>
    %cst_32 = arith.constant 1.000000e+00 : f32
    %58 = vector.broadcast %cst_32 : f32 to vector<16x128xf32>
    %59 = arith.addf %58, %57 : vector<16x128xf32>
    %60 = arith.mulf %54, %59 : vector<16x128xf32>
    %c0_33 = arith.constant 0 : index
    %c0_34 = arith.constant 0 : index
    %c0_35 = arith.constant 0 : index
    %61 = vector.load %arg9[%c0_33, %c0_34, %c0_35] : memref<1x1x128xf32, #tpu.memory_space<vmem>>, vector<1x1x128xf32>
    %62 = vector.shape_cast %61 : vector<1x1x128xf32> to vector<1x128xf32>
    %c0_36 = arith.constant 0 : index
    %c0_37 = arith.constant 0 : index
    %c0_38 = arith.constant 0 : index
    %63 = vector.load %arg10[%c0_36, %c0_37, %c0_38] : memref<1x1x128xf32, #tpu.memory_space<vmem>>, vector<1x1x128xf32>
    %64 = vector.shape_cast %63 : vector<1x1x128xf32> to vector<1x128xf32>
    %cst_39 = arith.constant dense<0.000000e+00> : vector<16xf32>
    %65 = vector.multi_reduction <add>, %60, %cst_39 [1] : vector<16x128xf32> to vector<16xf32>
    %66 = vector.shape_cast %65 : vector<16xf32> to vector<16x1xf32>
    %cst_40 = arith.constant 1.562500e-02 : f32
    %67 = vector.broadcast %cst_40 : f32 to vector<16x1xf32>
    %68 = arith.mulf %66, %67 : vector<16x1xf32>
    %69 = arith.mulf %60, %60 : vector<16x128xf32>
    %cst_41 = arith.constant dense<0.000000e+00> : vector<16xf32>
    %70 = vector.multi_reduction <add>, %69, %cst_41 [1] : vector<16x128xf32> to vector<16xf32>
    %71 = vector.shape_cast %70 : vector<16xf32> to vector<16x1xf32>
    %cst_42 = arith.constant 1.562500e-02 : f32
    %72 = vector.broadcast %cst_42 : f32 to vector<16x1xf32>
    %73 = arith.mulf %71, %72 : vector<16x1xf32>
    %74 = arith.mulf %68, %68 : vector<16x1xf32>
    %75 = arith.subf %73, %74 : vector<16x1xf32>
    %76 = vector.broadcast %68 : vector<16x1xf32> to vector<16x128xf32>
    %77 = arith.subf %60, %76 : vector<16x128xf32>
    %cst_43 = arith.constant 9.99999974E-6 : f32
    %78 = vector.broadcast %cst_43 : f32 to vector<16x1xf32>
    %79 = arith.addf %75, %78 : vector<16x1xf32>
    %80 = math.rsqrt %79 : vector<16x1xf32>
    %81 = vector.broadcast %80 : vector<16x1xf32> to vector<16x128xf32>
    %82 = arith.mulf %77, %81 : vector<16x128xf32>
    %83 = vector.broadcast %62 : vector<1x128xf32> to vector<16x128xf32>
    %84 = arith.mulf %82, %83 : vector<16x128xf32>
    %85 = vector.broadcast %64 : vector<1x128xf32> to vector<16x128xf32>
    %86 = arith.addf %84, %85 : vector<16x128xf32>
    %87 = vector.shape_cast %86 : vector<16x128xf32> to vector<2x8x128xf32>
    %c0_44 = arith.constant 0 : index
    %c0_45 = arith.constant 0 : index
    %c0_46 = arith.constant 0 : index
    %88 = vector.load %arg11[%c0_44, %c0_45, %c0_46] : memref<1x8x8xf32, #tpu.memory_space<vmem>>, vector<1x8x8xf32>
    %89 = vector.shape_cast %88 : vector<1x8x8xf32> to vector<1x8x8xf32>
    %90 = vector.broadcast %89 : vector<1x8x8xf32> to vector<2x8x8xf32>
    "tpu.trace_start"() <{level = 10 : i32, message = "bst,bth->bsh"}> : () -> ()
    %cst_47 = arith.constant dense<0.000000e+00> : vector<2x8x128xf32>
    %91 = tpu.matmul %90, %87, %cst_47 {dimension_numbers = #tpu.dot_dimension_numbers<[2], [1], [1], [2], [0, 0, 0, 1, 1, 2], [0], [0]>} : vector<2x8x8xf32>, vector<2x8x128xf32>, vector<2x8x128xf32> -> vector<2x8x128xf32>
    "tpu.trace_stop"() : () -> ()
    %c0_48 = arith.constant 0 : index
    %c0_49 = arith.constant 0 : index
    %c0_50 = arith.constant 0 : index
    %92 = vector.load %arg12[%c0_48, %c0_49, %c0_50] : memref<1x8x1xf32, #tpu.memory_space<vmem>>, vector<1x8x1xf32>
    %93 = vector.broadcast %92 : vector<1x8x1xf32> to vector<2x8x128xf32>
    %94 = arith.addf %91, %93 : vector<2x8x128xf32>
    %95 = vector.shape_cast %94 : vector<2x8x128xf32> to vector<16x128xf32>
    %96 = arith.mulf %45, %95 : vector<16x128xf32>
    %c0_51 = arith.constant 0 : index
    %c0_52 = arith.constant 0 : index
    %c0_53 = arith.constant 0 : index
    %97 = vector.load %arg13[%c0_51, %c0_52, %c0_53] : memref<1x128x128xf32, #tpu.memory_space<vmem>>, vector<1x128x128xf32>
    %98 = vector.shape_cast %97 : vector<1x128x128xf32> to vector<128x128xf32>
    %cst_54 = arith.constant dense<0.000000e+00> : vector<16x128xf32>
    %99 = tpu.matmul %96, %98, %cst_54 {dimension_numbers = #tpu.dot_dimension_numbers<[1], [0], [0], [1], [0, 0, 1, 1], [], []>} : vector<16x128xf32>, vector<128x128xf32>, vector<16x128xf32> -> vector<16x128xf32>
    %c0_55 = arith.constant 0 : index
    %c0_56 = arith.constant 0 : index
    %c0_57 = arith.constant 0 : index
    %100 = vector.load %arg14[%c0_55, %c0_56, %c0_57] : memref<1x1x128xf32, #tpu.memory_space<vmem>>, vector<1x1x128xf32>
    %101 = vector.shape_cast %100 : vector<1x1x128xf32> to vector<1x128xf32>
    %102 = vector.broadcast %101 : vector<1x128xf32> to vector<16x128xf32>
    %103 = arith.addf %99, %102 : vector<16x128xf32>
    %104 = vector.shape_cast %103 : vector<16x128xf32> to vector<2x8x128xf32>
    %105 = arith.addf %3, %104 : vector<2x8x128xf32>
    %c0_58 = arith.constant 0 : index
    %c0_59 = arith.constant 0 : index
    %c0_60 = arith.constant 0 : index
    %106 = vector.load %arg16[%c0_58, %c0_59, %c0_60] : memref<2x8x128xf32, #tpu.memory_space<vmem>>, vector<2x8x128xf32>
    tpu.vector_store %arg16[%c0_58, %c0_59, %c0_60], %105 {strides = array<i32>} : memref<2x8x128xf32, #tpu.memory_space<vmem>>, vector<2x8x128xf32>,
    %c3_i32 = arith.constant 3 : i32
    %107 = arith.cmpi eq, %arg1, %c3_i32 : i32
    %108 = arith.extui %107 : i1 to i32
    %c0_i32_61 = arith.constant 0 : i32
    %109 = arith.cmpi ne, %108, %c0_i32_61 : i32
    scf.if %109 {
      %c0_62 = arith.constant 0 : index
      %c0_63 = arith.constant 0 : index
      %c0_64 = arith.constant 0 : index
      %110 = vector.load %arg16[%c0_62, %c0_63, %c0_64] : memref<2x8x128xf32, #tpu.memory_space<vmem>>, vector<2x8x128xf32>
      %c0_65 = arith.constant 0 : index
      %c0_66 = arith.constant 0 : index
      %c0_67 = arith.constant 0 : index
      %111 = vector.load %arg15[%c0_65, %c0_66, %c0_67] : memref<2x8x128xf32, #tpu.memory_space<vmem>>, vector<2x8x128xf32>
      tpu.vector_store %arg15[%c0_65, %c0_66, %c0_67], %110 {strides = array<i32>} : memref<2x8x128xf32, #tpu.memory_space<vmem>>, vector<2x8x128xf32>,
    } else {
    }
    return
  }
  func.func @transform_0(%arg0: i32, %arg1: i32) -> (i32, i32, i32) {
    %c0_i32 = arith.constant 0 : i32
    %c0_i32_0 = arith.constant 0 : i32
    %c0_i32_1 = arith.constant 0 : i32
    return %arg0, %c0_i32, %c0_i32_0 : i32, i32, i32
  }
  func.func @transform_1(%arg0: i32, %arg1: i32) -> (i32, i32, i32) {
    %c0_i32 = arith.constant 0 : i32
    %c0_i32_0 = arith.constant 0 : i32
    %c0_i32_1 = arith.constant 0 : i32
    return %arg1, %c0_i32, %c0_i32_0 : i32, i32, i32
  }
  func.func @transform_2(%arg0: i32, %arg1: i32) -> (i32, i32, i32) {
    %c0_i32 = arith.constant 0 : i32
    %c0_i32_0 = arith.constant 0 : i32
    %c0_i32_1 = arith.constant 0 : i32
    return %arg1, %c0_i32, %c0_i32_0 : i32, i32, i32
  }
  func.func @transform_3(%arg0: i32, %arg1: i32) -> (i32, i32, i32) {
    %c0_i32 = arith.constant 0 : i32
    %c0_i32_0 = arith.constant 0 : i32
    %c0_i32_1 = arith.constant 0 : i32
    return %arg1, %c0_i32, %c0_i32_0 : i32, i32, i32
  }
  func.func @transform_4(%arg0: i32, %arg1: i32) -> (i32, i32, i32) {
    %c0_i32 = arith.constant 0 : i32
    %c0_i32_0 = arith.constant 0 : i32
    %c0_i32_1 = arith.constant 0 : i32
    return %arg1, %c0_i32, %c0_i32_0 : i32, i32, i32
  }
  func.func @transform_5(%arg0: i32, %arg1: i32) -> (i32, i32, i32) {
    %c0_i32 = arith.constant 0 : i32
    %c0_i32_0 = arith.constant 0 : i32
    %c0_i32_1 = arith.constant 0 : i32
    return %arg1, %c0_i32, %c0_i32_0 : i32, i32, i32
  }
  func.func @transform_6(%arg0: i32, %arg1: i32) -> (i32, i32, i32) {
    %c0_i32 = arith.constant 0 : i32
    %c0_i32_0 = arith.constant 0 : i32
    %c0_i32_1 = arith.constant 0 : i32
    return %arg1, %c0_i32, %c0_i32_0 : i32, i32, i32
  }
  func.func @transform_7(%arg0: i32, %arg1: i32) -> (i32, i32, i32) {
    %c0_i32 = arith.constant 0 : i32
    %c0_i32_0 = arith.constant 0 : i32
    %c0_i32_1 = arith.constant 0 : i32
    return %arg1, %c0_i32, %c0_i32_0 : i32, i32, i32
  }
  func.func @transform_8(%arg0: i32, %arg1: i32) -> (i32, i32, i32) {
    %c0_i32 = arith.constant 0 : i32
    %c0_i32_0 = arith.constant 0 : i32
    %c0_i32_1 = arith.constant 0 : i32
    return %arg1, %c0_i32, %c0_i32_0 : i32, i32, i32
  }
  func.func @transform_9(%arg0: i32, %arg1: i32) -> (i32, i32, i32) {
    %c0_i32 = arith.constant 0 : i32
    %c0_i32_0 = arith.constant 0 : i32
    %c0_i32_1 = arith.constant 0 : i32
    return %arg1, %c0_i32, %c0_i32_0 : i32, i32, i32
  }
  func.func @transform_10(%arg0: i32, %arg1: i32) -> (i32, i32, i32) {
    %c0_i32 = arith.constant 0 : i32
    %c0_i32_0 = arith.constant 0 : i32
    %c0_i32_1 = arith.constant 0 : i32
    return %arg1, %c0_i32, %c0_i32_0 : i32, i32, i32
  }
  func.func @transform_11(%arg0: i32, %arg1: i32) -> (i32, i32, i32) {
    %c0_i32 = arith.constant 0 : i32
    %c0_i32_0 = arith.constant 0 : i32
    %c0_i32_1 = arith.constant 0 : i32
    return %arg1, %c0_i32, %c0_i32_0 : i32, i32, i32
  }
  func.func @transform_12(%arg0: i32, %arg1: i32) -> (i32, i32, i32) {
    %c0_i32 = arith.constant 0 : i32
    %c0_i32_0 = arith.constant 0 : i32
    %c0_i32_1 = arith.constant 0 : i32
    return %arg1, %c0_i32, %c0_i32_0 : i32, i32, i32
  }
  func.func @transform_13(%arg0: i32, %arg1: i32) -> (i32, i32, i32) {
    %c0_i32 = arith.constant 0 : i32
    %c0_i32_0 = arith.constant 0 : i32
    %c0_i32_1 = arith.constant 0 : i32
    return %arg0, %c0_i32, %c0_i32_0 : i32, i32, i32
  }
}

</mosaic_0001>

<bundles_post_ra>
// kernel: tpu_custom_call.1
= control target key start
LH: loop header
LB: loop body
LE: loop exit
PB: predicated region body
PF: predicated region fallthrough
CT: control target
= control target key end

     0   :  { %s2755_s0 = inlined_call_operand.vmem [shape: f32[2,8,128], index: 0, kind: input, shape index: {}]   ;;  %s2756_s1 = inlined_call_operand.vmem [shape: f32[4,1,128], index: 1, kind: input, shape index: {}]   ;;  %s2757_s2 = inlined_call_operand.vmem [shape: f32[4,1,128], index: 2, kind: input, shape index: {}]   ;;  %s2758_s3 = inlined_call_operand.hbm [shape: f32[4,128,128], index: 3, kind: input, shape index: {}]   ;;  %s2759_s4 = inlined_call_operand.vmem [shape: f32[4,1,128], index: 4, kind: input, shape index: {}]   ;;  %s2760_s5 = inlined_call_operand.hbm [shape: f32[4,128,128], index: 5, kind: input, shape index: {}]   ;;  %s2761_s6 = inlined_call_operand.hbm [shape: f32[4,1,128], index: 6, kind: input, shape index: {}]   ;;  %s2762_s7 = inlined_call_operand.hbm [shape: f32[4,1,128], index: 7, kind: input, shape index: {}]   ;;  %s2763_s8 = inlined_call_operand.vmem [shape: f32[4,1,128], index: 8, kind: input, shape index: {}]   ;;  %s2764_s9 = inlined_call_operand.vmem [shape: f32[4,8,8], index: 9, kind: input, shape index: {}]   ;;  %s2765_s10 = inlined_call_operand.vmem [shape: f32[4,8,1], index: 10, kind: input, shape index: {}]   ;;  %s2766_s11 = inlined_call_operand.hbm [shape: f32[4,128,128], index: 11, kind: input, shape index: {}]   ;;  %s2767_s12 = inlined_call_operand.vmem [shape: f32[4,1,128], index: 12, kind: input, shape index: {}]   ;;  %s2768_s13 = inlined_call_operand.hbm [shape: f32[2,8,128], index: 13, kind: output, shape index: {}]  }
   0x1   :  { %2784 = sst [smem:[#allocation22_spill]] %s2755_s0 }
   0x2   :  { %2785 = sst [smem:[#allocation23_spill]] %s2758_s3 }
   0x3   :  { %2786 = sst [smem:[#allocation24_spill]] %s2760_s5 }
   0x4   :  { %2787 = sst [smem:[#allocation25_spill]] %s2761_s6 }
   0x5   :  { %2788 = sst [smem:[#allocation26_spill]] %s2762_s7 }
   0x6   :  { %2789 = sst [smem:[#allocation27_spill]] %s2763_s8 }
   0x7   :  { %2790 = sst [smem:[#allocation28_spill]] %s2764_s9 }
   0x8   :  { %2791 = sst [smem:[#allocation29_spill]] %s2765_s10 }
   0x9   :  { %2792 = sst [smem:[#allocation30_spill]] %s2766_s11 }
   0xa   :  { %2793 = sst [smem:[#allocation31_spill]] %s2767_s12 }
   0xb   :  { %2794 = sst [smem:[#allocation32_spill]] %s2768_s13 }
   0xc   :  { %18 = vsyncpa [#allocation4], 0 }
   0xd   :  { %20 = vsyncpa [#allocation4 + $0x1], 0 }
   0xe   :  { %21 = vsyncpa [#allocation7], 0 }
   0xf   :  { %23 = vsyncpa [#allocation7 + $0x1], 0 }
  0x10   :  { %24 = vsyncpa [#allocation10], 0 }
  0x11   :  { %26 = vsyncpa [#allocation10 + $0x1], 0 }
  0x12   :  { %27 = vsyncpa [#allocation5], 0  ;;  %s2284_s25 = smov 0   ;;  %s2286_s26 = smov 0  }
  0x13   :  { %s2288_s27 = smov 0   ;;  %s2290_s28 = smov 0  }
  0x14   :  { %s2292_s29 = smov 0   ;;  %s2294_s30 = smov 0  }
  0x15 LB: > { %2795 = sst [smem:[#allocation17_spill]] %s2187_s27  ;;  %s2313_s14 = sadd.s32 4294967295, %s2199_s30   ;;  %s2199_s30 = sphi %s2294_s30, %s33_s30   ;;  %s2195_s29 = sphi %s2292_s29, %s2833_s29   ;;  %s2191_s28 = sphi %s2290_s28, %s2832_s28   ;;  %s2187_s27 = sphi %s2288_s27, %s2831_s27   ;;  %s2183_s26 = sphi %s2286_s26, %s2835_s26   ;;  %s2179_s25 = sphi %s2284_s25, %s2834_s25  }
  0x16   : > { %2796 = sst [smem:[#allocation18_spill]] %s2195_s29  ;;  %s42_s15 = sadd.s32 1, %s2195_s29 }
  0x17   : > { %2797 = sst [smem:[#allocation19_spill]] %s2199_s30  ;;  %p43_p0 = scmp.ge.s32.totalorder %s42_s15, 4 }
  0x18   : > { %s130_s16 = sadd.s32 1, %s2187_s27  ;;  %p137_p1 = scmp.ne.s32.totalorder %s2187_s27, %s2183_s26 }
  0x19   : > { %p138_p2 = scmp.eq.s32.totalorder %s2199_s30, 0  ;;  %s2837_s15 = smov (%p43_p0, %s42_s15), 0 }
  0x1a   : > { %2798 = sst [smem:[#allocation20_spill]] %s2837_s15  ;;  %p143_p4 = scmp.ne.s32.totalorder %s2183_s26, %s2179_s25 }
  0x1b   : > { %p139_p3 = por %p138_p2, %p137_p1  ;;  %s127_s17 = ssub.s32 %s2195_s29, %s2837_s15 }
  0x1c   : > { %p144_p5 = scmp.eq.s32.totalorder %s2313_s14, 0  ;;  %p128_p6 = scmp.eq.s32.totalorder %s127_s17, 0 }
  0x1d   : > { %p1885_p8 = scmp.lt.s32.totalorder %s2199_s30, 4  ;;  %s2335_s20 = sand.u32 1, %s2187_s27  }
  0x1e   : > { %p2326_p7 = por %p144_p5, %p143_p4  ;;  %s2338_s21 = sshll.u32 %s2195_s29, 11 }
  0x1f   : > { %s2332_s19 = scalar_select %p128_p6, %s2187_s27, %s130_s16  }
  0x20   : > { %s2799_s18 = scalar_select %p2326_p7, 1, 0 }
  0x21   : > { %2800 = sst [smem:[#allocation21_spill]] %s2332_s19  ;;  %s2341_s22 = sshll.u32 %s2335_s20, 7 }
  0x22   : > { %p2343_p9 = pnand %p1885_p8, %p139_p3  ;;  %s2773_s24 = sand.u32 1, %s2199_s30  }
  0x23   : > { %s2802_s5 = sld [smem:[#allocation24_spill]]  ;;  %s479_s15 = scalar_lea.vmem [#allocation6], %s2341_s22 }
  0x24   : > { %s2801_s23 = scalar_select %p2343_p9, 1, 0 }
  0x25   : > { %s486_s19 = sshll.u32 %s479_s15, 4  ;;  %s2360_s27 = scalar_lea.sflag [#allocation7], %s2773_s24  ;;  %s2355_s19 = int_to_ptr.vmem [resolvable:$true] %s486_s19 }
  0x26   : > { %p2366_p12 = pneg %p2343_p9 }
  0x29   : > { %s2352_s16 = scalar_lea.hbm %s2802_s5, %s2338_s21  ;;  %s1966_s15 = scalar_lea.hbm %s2802_s5, 8192 }
  0x2a   : > { %s1961_s13 = scalar_lea.hbm %s2352_s16, 2048  ;;  %p1967_p1 = scmp.lt.u32.totalorder %s2352_s16, %s2802_s5 }
  0x2b   : > { %p1962_p11 = scmp.ne.s32.totalorder %s2352_s16, %s1961_s13  ;;  %p1968_p2 = scmp.lt.u32.totalorder %s1966_s15, %s1961_s13 }
  0x2c   : > { %p1970_p4 = scmp.lt.u32.totalorder %s1961_s13, %s2352_s16 }
  0x2d   : > { %p1964_p13 = pnand %p2366_p12, %p1962_p11  ;;  %p1969_p3 = por %p1968_p2, %p1967_p1 }
  0x2f   : > { %p1965_p0 = pneg %p1964_p13  ;;  %p1971_p5 = por %p1970_p4, %p1969_p3 }
  0x31   : > { %p1972_p6 = pnand %p1971_p5, %p1965_p0 }
  0x33   : > { %1975 = shalt.err (!%p1972_p6)
}
  0x34   : > { %s1976_s24 = scalar_lea.vmem %s2355_s19, 2048  ;;  %s2201_s25 = smov [#allocation6]  }
  0x35   : > { %p1977_p8 = scmp.ne.s32.totalorder %s2355_s19, %s1976_s24  ;;  %s1981_s17 = sshll.u32 %s2201_s25, 4  ;;  %s1982_s17 = int_to_ptr.vmem [resolvable:$false] %s1981_s17 }
  0x36   : > { %s1983_s9 = scalar_lea.vmem %s1982_s17, 4096  ;;  %p1984_p10 = scmp.lt.s32.totalorder %s2355_s19, %s1982_s17 }
  0x37   : > { %p1979_p11 = pnand %p1977_p8, %p2366_p12  ;;  %p1985_p7 = scmp.lt.s32.totalorder %s1983_s9, %s1976_s24 }
  0x39   : > { %p1980_p13 = pneg %p1979_p11  ;;  %p1986_p1 = por %p1985_p7, %p1984_p10 }
  0x3b   : > { %p1987_p2 = pnand %p1986_p1, %p1980_p13 }
  0x3d   : > { %1990 = shalt.err (!%p1987_p2)
}
  0x3e   : > { %s2775_s10 = smov 128   ;;  %s2777_s13 = smov 8  }
  0x3f   : > { %1875 = dma.hbm_to_vmem [thread:$0]  (!%p2343_p9), %s2352_s16, 2048, %s2355_s19, %s2360_s27, %s2775_s10, %s2775_s10, %s2777_s13  }
  0x40   : > { %p575_p7 = scmp.lt.s32.totalorder %s2199_s30, 5  ;;  %s1557_s24 = sshll.u32 %s2195_s29, 4 }
  0x41   : > { %s2804_s6 = sld [smem:[#allocation25_spill]]  ;;  %p2805_p10 = scmp.ge.s32.totalorder %s2199_s30, 1 }
  0x42   : > { %s2807_s7 = sld [smem:[#allocation26_spill]]  ;;  %s516_s19 = scalar_lea.vmem [#allocation9], %s2335_s20 }
  0x43   : > { %p2402_p0 = pnand %p2805_p10, %p575_p7  ;;  %s523_s16 = sshll.u32 %s516_s19, 4  ;;  %s524_s16 = int_to_ptr.vmem [resolvable:$true] %s523_s16 }
  0x44   : > { %s2808_s15 = sand.u32 1, %s2199_s30  }
  0x45   : > { %s2806_s9 = scalar_select %p2402_p0, 1, 0 }
  0x46   : > { %s2414_s25 = scalar_lea.sflag [#allocation10], %s2808_s15 }
  0x47   : > { %s2398_s17 = scalar_lea.hbm %s2804_s6, %s1557_s24 }
  0x48   : > { %s2409_s8 = scalar_lea.hbm %s2807_s7, %s1557_s24  ;;  %s1996_s5 = scalar_lea.hbm %s2807_s7, 64 }
  0x49   : > { %s1991_s10 = scalar_lea.hbm %s2409_s8, 16  ;;  %p1997_p6 = scmp.lt.u32.totalorder %s2409_s8, %s2807_s7 }
  0x4a   : > { %p1992_p3 = scmp.ne.s32.totalorder %s2409_s8, %s1991_s10  ;;  %p1998_p8 = scmp.lt.u32.totalorder %s1996_s5, %s1991_s10 }
  0x4b   : > { %p2000_p13 = scmp.lt.u32.totalorder %s1991_s10, %s2409_s8 }
  0x4c   : > { %p1994_p4 = pnand %p1992_p3, %p2366_p12  ;;  %p1999_p11 = por %p1998_p8, %p1997_p6 }
  0x4e   : > { %p1995_p5 = pneg %p1994_p4  ;;  %p2001_p1 = por %p2000_p13, %p1999_p11 }
  0x50   : > { %p2002_p2 = pnand %p2001_p1, %p1995_p5 }
  0x52   : > { %2005 = shalt.err (!%p2002_p2)
}
  0x53   : > { %s2006_s19 = scalar_lea.vmem %s524_s16, 16  ;;  %s2204_s15 = smov [#allocation9]  }
  0x54   : > { %p2007_p7 = scmp.ne.s32.totalorder %s524_s16, %s2006_s19  ;;  %s2011_s30 = sshll.u32 %s2204_s15, 4  ;;  %s2012_s30 = int_to_ptr.vmem [resolvable:$false] %s2011_s30 }
  0x55   : > { %s2013_s29 = scalar_lea.vmem %s2012_s30, 32  ;;  %p2014_p4 = scmp.lt.s32.totalorder %s524_s16, %s2012_s30 }
  0x56   : > { %p2009_p10 = pnand %p2007_p7, %p2366_p12  ;;  %p2015_p0 = scmp.lt.s32.totalorder %s2013_s29, %s2006_s19 }
  0x58   : > { %p2010_p3 = pneg %p2009_p10  ;;  %p2016_p9 = por %p2015_p0, %p2014_p4 }
  0x5a   : > { %p2017_p6 = pnand %p2016_p9, %p2010_p3 }
  0x5c   : > { %2020 = shalt.err (!%p2017_p6)
}
  0x5d   : > { %p2809_p8 = scmp.ne.s32.totalorder %s2801_s23, 0  ;;  %s2810_s3 = sld [smem:[#allocation23_spill]] }
  0x5e   : > { %s452_s30 = scalar_lea.vmem [#allocation3], %s2341_s22  ;;  %s499_s24 = scalar_lea.vmem [#allocation8], %s2335_s20 }
  0x5f   : > { %1881 = dma.hbm_to_vmem [thread:$0]  (!%p2809_p8), %s2409_s8, 16, %s524_s16, %s2414_s25  }
  0x60   : > { %s459_s12 = sshll.u32 %s452_s30, 4  ;;  %s2444_s19 = sshll.u32 %s499_s24, 4  ;;  %s2441_s12 = int_to_ptr.vmem [resolvable:$true] %s459_s12  ;;  %s507_s19 = int_to_ptr.vmem [resolvable:$true] %s2444_s19 }
  0x61   : > { %s449_s15 = scalar_lea.sflag [#allocation4], %s2335_s20 }
  0x63   : > { %s2438_s5 = scalar_lea.hbm %s2810_s3, %s2338_s21  ;;  %s2026_s10 = scalar_lea.hbm %s2810_s3, 8192 }
  0x64   : > { %s2021_s29 = scalar_lea.hbm %s2438_s5, 2048  ;;  %p2027_p11 = scmp.lt.u32.totalorder %s2438_s5, %s2810_s3 }
  0x65   : > { %p2022_p9 = scmp.ne.s32.totalorder %s2438_s5, %s2021_s29  ;;  %p2028_p13 = scmp.lt.u32.totalorder %s2026_s10, %s2021_s29 }
  0x66   : > { %p2030_p2 = scmp.lt.u32.totalorder %s2021_s29, %s2438_s5 }
  0x67   : > { %p2024_p0 = pnand %p2022_p9, %p2366_p12  ;;  %p2029_p1 = por %p2028_p13, %p2027_p11 }
  0x69   : > { %p2025_p5 = pneg %p2024_p0  ;;  %p2031_p7 = por %p2030_p2, %p2029_p1 }
  0x6b   : > { %p2032_p10 = pnand %p2031_p7, %p2025_p5 }
  0x6d   : > { %2035 = shalt.err (!%p2032_p10)
}
  0x6e   : > { %s2036_s30 = scalar_lea.vmem %s2441_s12, 2048  ;;  %s2205_s24 = smov [#allocation3]  }
  0x6f   : > { %p2037_p3 = scmp.ne.s32.totalorder %s2441_s12, %s2036_s30  ;;  %s2041_s8 = sshll.u32 %s2205_s24, 4  ;;  %s2042_s8 = int_to_ptr.vmem [resolvable:$false] %s2041_s8 }
  0x70   : > { %s2043_s7 = scalar_lea.vmem %s2042_s8, 4096  ;;  %p2044_p9 = scmp.lt.s32.totalorder %s2441_s12, %s2042_s8 }
  0x71   : > { %p2039_p4 = pnand %p2037_p3, %p2366_p12  ;;  %p2045_p0 = scmp.lt.s32.totalorder %s2043_s7, %s2036_s30 }
  0x73   : > { %p2040_p6 = pneg %p2039_p4  ;;  %p2046_p11 = por %p2045_p0, %p2044_p9 }
  0x75   : > { %p2047_p13 = pnand %p2046_p11, %p2040_p6 }
  0x77   : > { %2050 = shalt.err (!%p2047_p13)
}
  0x78   : > { %s2811_s29 = smov 8   ;;  %s2812_s16 = smov 128  }
  0x79   : > { %1872 = dma.hbm_to_vmem [thread:$0]  (!%p2809_p8), %s2438_s5, 2048, %s2441_s12, %s449_s15, %s2812_s16, %s2812_s16, %s2811_s29  }
  0x7a   : > { %s2051_s10 = scalar_lea.hbm %s2398_s17, 16  ;;  %s2056_s24 = scalar_lea.hbm %s2804_s6, 64 }
  0x7b   : > { %p2052_p5 = scmp.ne.s32.totalorder %s2398_s17, %s2051_s10  ;;  %p2057_p7 = scmp.lt.u32.totalorder %s2398_s17, %s2804_s6 }
  0x7c   : > { %p2058_p10 = scmp.lt.u32.totalorder %s2056_s24, %s2051_s10  ;;  %p2060_p4 = scmp.lt.u32.totalorder %s2051_s10, %s2398_s17 }
  0x7d   : > { %p2054_p1 = pnand %p2052_p5, %p2366_p12 }
  0x7e   : > { %p2059_p3 = por %p2058_p10, %p2057_p7 }
  0x7f   : > { %p2055_p2 = pneg %p2054_p1 }
  0x80   : > { %p2061_p6 = por %p2060_p4, %p2059_p3 }
  0x82   : > { %p2062_p9 = pnand %p2061_p6, %p2055_p2 }
  0x84   : > { %2065 = shalt.err (!%p2062_p9)
}
  0x85   : > { %s2066_s5 = scalar_lea.vmem %s507_s19, 16  ;;  %s2206_s12 = smov [#allocation8]  }
  0x86   : > { %p2067_p0 = scmp.ne.s32.totalorder %s507_s19, %s2066_s5  ;;  %s2071_s15 = sshll.u32 %s2206_s12, 4  ;;  %s2072_s15 = int_to_ptr.vmem [resolvable:$false] %s2071_s15 }
  0x87   : > { %s2073_s7 = scalar_lea.vmem %s2072_s15, 32  ;;  %p2074_p5 = scmp.lt.s32.totalorder %s507_s19, %s2072_s15 }
  0x88   : > { %p2069_p11 = pnand %p2067_p0, %p2366_p12  ;;  %p2075_p1 = scmp.lt.s32.totalorder %s2073_s7, %s2066_s5 }
  0x8a   : > { %p2070_p13 = pneg %p2069_p11  ;;  %p2076_p8 = por %p2075_p1, %p2074_p5 }
  0x8c   : > { %p2077_p7 = pnand %p2076_p8, %p2070_p13 }
  0x8e   : > { %2080 = shalt.err (!%p2077_p7)
}
  0x8f   : > { %p2813_p10 = scmp.ne.s32.totalorder %s2801_s23, 0  ;;  %s2814_s11 = sld [smem:[#allocation30_spill]] }
  0x90   : > { %s554_s24 = scalar_lea.vmem [#allocation11], %s2341_s22 }
  0x91   : > { %1878 = dma.hbm_to_vmem [thread:$0]  (!%p2813_p10), %s2398_s17, 16, %s507_s19, %s2360_s27  }
  0x92   : > { %s561_s20 = sshll.u32 %s554_s24, 4  ;;  %s2499_s20 = int_to_ptr.vmem [resolvable:$true] %s561_s20 }
  0x95   : > { %s2496_s30 = scalar_lea.hbm %s2814_s11, %s2338_s21  ;;  %s2086_s17 = scalar_lea.hbm %s2814_s11, 8192 }
  0x96   : > { %s2081_s8 = scalar_lea.hbm %s2496_s30, 2048  ;;  %p2087_p4 = scmp.lt.u32.totalorder %s2496_s30, %s2814_s11 }
  0x97   : > { %p2082_p8 = scmp.ne.s32.totalorder %s2496_s30, %s2081_s8  ;;  %p2088_p6 = scmp.lt.u32.totalorder %s2086_s17, %s2081_s8 }
  0x98   : > { %p2090_p0 = scmp.lt.u32.totalorder %s2081_s8, %s2496_s30 }
  0x99   : > { %p2084_p2 = pnand %p2082_p8, %p2366_p12  ;;  %p2089_p9 = por %p2088_p6, %p2087_p4 }
  0x9b   : > { %p2085_p3 = pneg %p2084_p2  ;;  %p2091_p11 = por %p2090_p0, %p2089_p9 }
  0x9d   : > { %p2092_p13 = pnand %p2091_p11, %p2085_p3 }
  0x9f   : > { %2095 = shalt.err (!%p2092_p13)
}
  0xa0   : > { %s2096_s22 = scalar_lea.vmem %s2499_s20, 2048  ;;  %s2207_s12 = smov [#allocation11]  }
  0xa1   : > { %p2097_p5 = scmp.ne.s32.totalorder %s2499_s20, %s2096_s22  ;;  %s2101_s15 = sshll.u32 %s2207_s12, 4  ;;  %s2102_s15 = int_to_ptr.vmem [resolvable:$false] %s2101_s15 }
  0xa2   : > { %s2103_s7 = scalar_lea.vmem %s2102_s15, 4096  ;;  %p2104_p8 = scmp.lt.s32.totalorder %s2499_s20, %s2102_s15 }
  0xa3   : > { %p2099_p1 = pnand %p2097_p5, %p2366_p12  ;;  %p2105_p2 = scmp.lt.s32.totalorder %s2103_s7, %s2096_s22 }
  0xa5   : > { %p2100_p7 = pneg %p2099_p1  ;;  %p2106_p4 = por %p2105_p2, %p2104_p8 }
  0xa7   : > { %p2107_p6 = pnand %p2106_p4, %p2100_p7 }
  0xa9   : > { %2110 = shalt.err (!%p2107_p6)
}
  0xaa   : > { %1884 = dma.hbm_to_vmem [thread:$0]  (!%p2813_p10), %s2496_s30, 2048, %s2499_s20, %s2414_s25, %s2812_s16, %s2812_s16, %s2811_s29  }
  0xab   : > { %p2815_p12 = scmp.ne.s32.totalorder %s2806_s9, 0 }
  0xac   : > { %s2529_s0 = sand.u32 (!%p2815_p12), 1, %s2183_s26   ;;  %p2816_p3 = scmp.ne.s32.totalorder (!%p2815_p12), %s2799_s18, 0 }
  0xad   : > { %579 = sbr.rel (%p2815_p12) target bundleno = 1256 (0x4e8), region = 72  ;;  %s1563_s10 = sshll.u32 (!%p2815_p12), %s2529_s0, 7 }
  0xae   : > { %s582_s13 = scalar_lea.sflag (!%p2815_p12), [#allocation4], %s2529_s0  ;;  %s2533_s24 = scalar_lea.vmem (!%p2815_p12), [#allocation3], %s1563_s10 }
  0xb4   : > { %2162 = dma.done.wait (%p2816_p3), %s582_s13, 2048  }
  0xb5   : > { %2164 = vsyncadd (%p2816_p3), %s582_s13, 4294965248  ;;  %s590_s23 = sand.u32 1, %s2313_s14   ;;  %s2540_s25 = scalar_lea.vmem [#allocation6], %s1563_s10 }
  0xb6   : > { %s591_s9 = scalar_lea.sflag [#allocation7], %s590_s23 }
  0xb7   : > { %2166 = dma.done.wait (%p2816_p3), %s591_s9, 2064  }
  0xb8   : > { %2168 = vsyncadd (%p2816_p3), %s591_s9, 4294965232  ;;  %s608_s16 = scalar_lea.sflag [#allocation10], %s590_s23 }
  0xb9   : > { %2170 = dma.done.wait (%p2816_p3), %s608_s16, 2064  }
  0xba   : > { %2172 = vsyncadd (%p2816_p3), %s608_s16, 4294965232  ;;  %p709_p10 = scmp.lt.s32.totalorder %s2191_s28, 3  ;;  %s2817_s13 = sld [smem:[#allocation27_spill]] }
  0xbb   : > { %s2818_s5 = sld [smem:[#allocation31_spill]]  ;;  %s2819_s27 = sld [smem:[#allocation28_spill]] }
  0xbc   : > { %s2554_s20 = scalar_select %p709_p10, %s2191_s28, 3 }
  0xbd   : > { %s2820_s18 = sld [smem:[#allocation29_spill]]  ;;  %s2587_s21 = scalar_lea.vmem [#allocation11], %s1563_s10 }
  0xbe   : > { %s717_s12 = scalar_lea.vmem %s2759_s4, %s2554_s20  ;;  %s1566_s9 = sshll.u32 %s2554_s20, 3 }
  0xbf   : > { %p1568_p9 = scmp.ne.s32.totalorder %s2191_s28, 0 }
  0xc0   : > { %s720_s23 = scalar_lea.vmem %s2817_s13, %s2554_s20  ;;  %s2821_s7 = sld [smem:[#allocation22_spill]] (!%p1568_p9) }
  0xc1   : > { %s731_s30 = scalar_lea.vmem %s2818_s5, %s2554_s20  ;;  %s2580_s6 = scalar_lea.vmem %s2819_s27, %s1566_s9 }
  0xc2   : > { %736 = sbr.rel (%p1568_p9) target bundleno = 201 (0xc9), region = 96 }
  0xc3   : > { %s2585_s11 = scalar_lea.vmem %s2820_s18, %s1566_s9 }
  0xc6   : > { %v737_v0 = vld [vmem:[%s2821_s7] sm:$0xff] (!%p1568_p9)  ;;  %v738_v1 = vld [vmem:[%s2821_s7 + $0x8] sm:$0xff] (!%p1568_p9) }
  0xc7   : > { %739 = vst [vmem:[#allocation2] sm:$0xff] (!%p1568_p9), %v737_v0  ;;  %740 = vst [vmem:[#allocation2 + $0x8] sm:$0xff] (!%p1568_p9), %v738_v1 }
  0xc9 PF: > { %v787_v4 = vld [vmem:[%s2533_s24] sm:$0xff]  ;;  %v788_v6 = vld [vmem:[%s2533_s24 + $0x8] sm:$0xff]  ;;  %v789_v12 = vld [vmem:[%s2533_s24 + $0x10] sm:$0xff]  ;;  %s2823_s27 = scalar_lea.vmem %s2757_s2, %s2554_s20  ;;  %s2824_s18 = scalar_lea.vmem [#allocation8], %s2529_s0  ;;  %vm2209_vm0 = vmmov 0   ;;  %vm1054_vm1 = vcmask 64512  }
  0xca   : > { %v895_v7 = vld [vmem:[%s2540_s25] sm:$0xff]  ;;  %v896_v8 = vld [vmem:[%s2540_s25 + $0x8] sm:$0xff]  ;;  %v1759_v9 = vpack.c.bf16 %v788_v6, %v787_v4  ;;  %v790_v13 = vld [vmem:[%s2533_s24 + $0x18] sm:$0xff]  ;;  %p1578_p0 = scmp.ne.s32.totalorder %s2191_s28, 3 }
  0xcb   : > { %v1791_v10 = vpack.c.bf16 %v896_v8, %v895_v7  ;;  %v897_v14 = vld [vmem:[%s2540_s25 + $0x10] sm:$0xff]  ;;  %v1763_v15 = vpack.c.bf16 %v790_v13, %v789_v12  ;;  %v898_v16 = vld [vmem:[%s2540_s25 + $0x18] sm:$0xff]  ;;  %v791_v18 = vld [vmem:[%s2533_s24 + $0x20] sm:$0xff] }
  0xcc   : > { %1760 = vmatprep.subr.bf16.mxu0 %v1759_v9  ;;  %v1795_v17 = vpack.c.bf16 %v898_v16, %v897_v14  ;;  %v792_v19 = vld [vmem:[%s2533_s24 + $0x28] sm:$0xff]  ;;  %v899_v20 = vld [vmem:[%s2540_s25 + $0x20] sm:$0xff]  ;;  %v793_v24 = vld [vmem:[%s2533_s24 + $0x30] sm:$0xff] }
  0xcd   : > { %1792 = vmatprep.subr.bf16.mxu1 %v1791_v10  ;;  %1762 = vmatpush3.bf16.msra.mxu0 %v1759_v9  ;;  %v1767_v21 = vpack.c.bf16 %v792_v19, %v791_v18  ;;  %v900_v22 = vld [vmem:[%s2540_s25 + $0x28] sm:$0xff]  ;;  %v794_v25 = vld [vmem:[%s2533_s24 + $0x38] sm:$0xff]  ;;  %v901_v26 = vld [vmem:[%s2540_s25 + $0x30] sm:$0xff] }
  0xce   : > { %v2596_v2 = vld [vmem:[#allocation2] sm:$0xff]  ;;  %v2598_v3 = vld [vmem:[#allocation2 + $0x8] sm:$0xff]  ;;  %1794 = vmatpush3.bf16.msra.mxu1 %v1791_v10  ;;  %1764 = vmatprep.subr.bf16.mxu0 %v1763_v15  ;;  %v1799_v23 = vpack.c.bf16 %v900_v22, %v899_v20  ;;  %v1771_v27 = vpack.c.bf16 %v794_v25, %v793_v24  ;;  %v795_v30 = vld [vmem:[%s2533_s24 + $0x40] sm:$0xff] }
  0xcf   : > { %745 = vadd.xlane.f32.xlu0 %v2596_v2  ;;  %v751_v5 = vmul.f32 %v2596_v2, %v2596_v2  ;;  %v752_v11 = vmul.f32 %v2598_v3, %v2598_v3  ;;  %1796 = vmatprep.subr.bf16.mxu1 %v1795_v17  ;;  %v902_v28 = vld [vmem:[%s2540_s25 + $0x38] sm:$0xff]  ;;  %v796_v31 = vld [vmem:[%s2533_s24 + $0x48] sm:$0xff]  ;;  %v903_v32 = vld [vmem:[%s2540_s25 + $0x40] sm:$0xff] }
  0xd0   : > { %v1803_v29 = vpack.c.bf16 %v902_v28, %v901_v26  ;;  %v1775_v33 = vpack.c.bf16 %v796_v31, %v795_v30  ;;  %v904_v34 = vld [vmem:[%s2540_s25 + $0x48] sm:$0xff]  ;;  %v797_v36 = vld [vmem:[%s2533_s24 + $0x50] sm:$0xff]  ;;  %v798_v37 = vld [vmem:[%s2533_s24 + $0x58] sm:$0xff] }
  0xd1   : > { %753 = vadd.xlane.f32.xlu1 %v751_v5  ;;  %1766 = vmatpush3.bf16.msra.mxu0 %v1763_v15  ;;  %v1807_v35 = vpack.c.bf16 %v904_v34, %v903_v32  ;;  %v905_v38 = vld [vmem:[%s2540_s25 + $0x50] sm:$0xff]  ;;  %v1779_v39 = vpack.c.bf16 %v798_v37, %v797_v36  ;;  %v906_v40 = vld [vmem:[%s2540_s25 + $0x58] sm:$0xff]  ;;  %v799_v41 = vld [vmem:[%s2533_s24 + $0x60] sm:$0xff]  ;;  %v2208_v37 = vmov 0.0  }
  0xd2   : > { %1798 = vmatpush3.bf16.msra.mxu1 %v1795_v17  ;;  %1768 = vmatprep.subr.bf16.mxu0 %v1767_v21  ;;  %v800_v42 = vld [vmem:[%s2533_s24 + $0x68] sm:$0xff]  ;;  %v1811_v43 = vpack.c.bf16 %v906_v40, %v905_v38  ;;  %v907_v44 = vld [vmem:[%s2540_s25 + $0x60] sm:$0xff]  ;;  %v801_v48 = vld [vmem:[%s2533_s24 + $0x70] sm:$0xff] }
  0xd3   : > { %747 = vadd.xlane.f32.xlu0 %v2598_v3  ;;  %1800 = vmatprep.subr.bf16.mxu1 %v1799_v23  ;;  %v908_v45 = vld [vmem:[%s2540_s25 + $0x68] sm:$0xff]  ;;  %v1783_v46 = vpack.c.bf16 %v800_v42, %v799_v41  ;;  %v802_v49 = vld [vmem:[%s2533_s24 + $0x78] sm:$0xff]  ;;  %v909_v51 = vld [vmem:[%s2540_s25 + $0x70] sm:$0xff]  ;;  %s2822_s24 = scalar_lea.vmem %s2756_s1, %s2554_s20  ;;  %v2210_v41 = vmov 0  }
  0xd4   : > { %v1815_v47 = vpack.c.bf16 %v908_v45, %v907_v44  ;;  %v1787_v50 = vpack.c.bf16 %v802_v49, %v801_v48  ;;  %v910_v52 = vld [vmem:[%s2540_s25 + $0x78] sm:$0xff]  ;;  %v1569_v8 = vld [vmem:[%s2822_s24] ss:$0 sm:$0xff]  ;;  %1944 = vset.pattern.permute.xlu0 %v2210_v41 }
  0xd5   : > { %755 = vadd.xlane.f32.xlu1 %v752_v11  ;;  %1770 = vmatpush3.bf16.msra.mxu0 %v1767_v21  ;;  %v1819_v53 = vpack.c.bf16 %v910_v52, %v909_v51  ;;  %v1570_v10 = vld [vmem:[%s2823_s27] ss:$0 sm:$0xff]  ;;  %v1203_v44 = vld [vmem:[%s2587_s21 + $0x18] sm:$0xff]  ;;  %v1206_v49 = vld [vmem:[%s2587_s21 + $0x30] sm:$0xff] }
  0xd6   : > { %1802 = vmatpush3.bf16.msra.mxu1 %v1799_v23  ;;  %1772 = vmatprep.subr.bf16.mxu0 %v1771_v27  ;;  %v1572_v18 = vld [vmem:[%s2824_s18] ss:$0 sm:$0xff]  ;;  %v1208_v52 = vld [vmem:[%s2587_s21 + $0x40] sm:$0xff] }
  0xd7   : > { %1804 = vmatprep.subr.bf16.mxu1 %v1803_v29  ;;  %v1048_v38 = vld [vmem:[%s2585_s11] sm:$0xff]  ;;  %s2825_s11 = scalar_lea.vmem [#allocation9], %s2529_s0 }
  0xd8   : > { %v1201_v40 = vld [vmem:[%s2587_s21 + $0x8] sm:$0xff] }
  0xd9   : > { %1774 = vmatpush3.bf16.msra.mxu0 %v1771_v27 }
  0xda   : > { %1806 = vmatpush3.bf16.msra.mxu1 %v1803_v29  ;;  %1776 = vmatprep.subr.bf16.mxu0 %v1775_v33 }
  0xdb   : > { %1808 = vmatprep.subr.bf16.mxu1 %v1807_v35 }
  0xdd   : > { %1778 = vmatpush3.bf16.msra.mxu0 %v1775_v33 }
  0xde   : > { %1810 = vmatpush3.bf16.msra.mxu1 %v1807_v35  ;;  %1780 = vmatprep.subr.bf16.mxu0 %v1779_v39 }
  0xdf   : > { %1812 = vmatprep.subr.bf16.mxu1 %v1811_v43 }
  0xe1   : > { %1782 = vmatpush3.bf16.msra.mxu0 %v1779_v39  ;;  %v1200_v39 = vld [vmem:[%s2587_s21] sm:$0xff] }
  0xe2   : > { %1814 = vmatpush3.bf16.msra.mxu1 %v1811_v43  ;;  %1784 = vmatprep.subr.bf16.mxu0 %v1783_v46  ;;  %v1823_v42 = vpack.c.bf16 %v1201_v40, %v1200_v39  ;;  %v1202_v43 = vld [vmem:[%s2587_s21 + $0x10] sm:$0xff] }
  0xe3   : > { %1816 = vmatprep.subr.bf16.mxu1 %v1815_v47  ;;  %v1827_v45 = vpack.c.bf16 %v1203_v44, %v1202_v43 }
  0xe5   : > { %1786 = vmatpush3.bf16.msra.mxu0 %v1783_v46  ;;  %v1204_v46 = vld [vmem:[%s2587_s21 + $0x20] sm:$0xff] }
  0xe6   : > { %1818 = vmatpush3.bf16.msra.mxu1 %v1815_v47  ;;  %1788 = vmatprep.subr.bf16.mxu0 %v1787_v50  ;;  %v1205_v47 = vld [vmem:[%s2587_s21 + $0x28] sm:$0xff] }
  0xe7   : > { %1820 = vmatprep.subr.bf16.mxu1 %v1819_v53  ;;  %v1831_v48 = vpack.c.bf16 %v1205_v47, %v1204_v46 }
  0xe9   : > { %1790 = vmatpush3.bf16.msra.mxu0 %v1787_v50  ;;  %v1207_v50 = vld [vmem:[%s2587_s21 + $0x38] sm:$0xff] }
  0xea   : > { %1822 = vmatpush3.bf16.msra.mxu1 %v1819_v53  ;;  %1824 = vmatprep.subr.bf16.mxu0 %v1823_v42  ;;  %v1835_v51 = vpack.c.bf16 %v1207_v50, %v1206_v49  ;;  %v1209_v53 = vld [vmem:[%s2587_s21 + $0x48] sm:$0xff] }
  0xeb   : > { %1714 = vmatprep.subr.mxu1 %v2208_v37 }
 0x15c   : > { %v746_v54 = vpop.xlane.xlu0 %745 }
 0x15d   : > { %v749_v55 = vmul.f32 0.03125, %v746_v54  ;;  %v1839_v54 = vpack.c.bf16 %v1209_v53, %v1208_v52 }
 0x15e   : > { %v754_v56 = vpop.xlane.xlu1 %753 }
 0x15f   : > { %v759_v57 = vmul.f32 %v749_v55, %v749_v55  ;;  %v757_v58 = vmul.f32 0.03125, %v754_v56  ;;  %v763_v6 = vsub.f32 %v2596_v2, %v749_v55  ;;  %v1210_v55 = vld [vmem:[%s2587_s21 + $0x50] sm:$0xff]  ;;  %v1211_v56 = vld [vmem:[%s2587_s21 + $0x58] sm:$0xff] }
 0x160   : > { %v748_v59 = vpop.xlane.xlu0 %747 }
 0x161   : > { %v761_v60 = vsub.f32 %v757_v58, %v759_v57  ;;  %v750_v61 = vmul.f32 0.03125, %v748_v59  ;;  %v1843_v57 = vpack.c.bf16 %v1211_v56, %v1210_v55 }
 0x162   : > { %v756_v62 = vpop.xlane.xlu1 %755 }
 0x163   : > { %v765_v63 = vadd.f32 1e-05, %v761_v60  ;;  %v760_v0 = vmul.f32 %v750_v61, %v750_v61  ;;  %v758_v1 = vmul.f32 0.03125, %v756_v62  ;;  %v764_v11 = vsub.f32 %v2598_v3, %v750_v61 }
 0x165   : > { %1945 = vrsqrt.f32 %v765_v63  ;;  %v762_v4 = vsub.f32 %v758_v1, %v760_v0 }
 0x167   : > { %v766_v5 = vadd.f32 1e-05, %v762_v4 }
 0x169   : > { %1947 = vrsqrt.f32 %v766_v5 }
 0x16f   : > { %v1946_v7 = vpop.eup %1945 }
 0x170   : > { %v769_v9 = vmul.f32 %v1946_v7, %v763_v6 }
 0x172   : > { %v777_v12 = vmul.f32 %v1569_v8, %v769_v9 }
 0x173   : > { %v1948_v13 = vpop.eup %1947 }
 0x174   : > { %v770_v14 = vmul.f32 %v1948_v13, %v764_v11  ;;  %v785_v15 = vadd.f32 %v1570_v10, %v777_v12  ;;  %v1573_v12 = vld [vmem:[%s2825_s11] ss:$0 sm:$0xff] }
 0x176   : > { %v778_v16 = vmul.f32 %v1569_v8, %v770_v14  ;;  %1676 = vmatprep.mubr.f32.mxu0 %v785_v15  ;;  %1711 = vmatprep.mubr.f32.mxu1 %v785_v15  ;;  %v1574_v14 = vld [vmem:[%s720_s23] ss:$0 sm:$0xff] }
 0x178   : > { %v786_v17 = vadd.f32 %v1570_v10, %v778_v16 }
 0x17a   : > { %1677 = vmatmul.mubr.f32.vlgmr.msra.gmra.mrb[0].mxu0 %v786_v17  ;;  %1712 = vmatmul.mubr.f32.vlgmr.msra.gmra.mrb[0].mxu1 %v786_v17 }
 0x17b   : > { %1716 = vmatprep.mubr.msk.f32.mxu1 %vm2209_vm0, %v2208_v37  ;;  %1826 = vmatpush3.bf16.msra.mxu0 %v1823_v42 }
 0x17c   : > { %1828 = vmatprep.subr.bf16.mxu0 %v1827_v45 }
 0x17f   : > { %1830 = vmatpush3.bf16.msra.mxu0 %v1827_v45 }
 0x180   : > { %1832 = vmatprep.subr.bf16.mxu0 %v1831_v48 }
 0x183   : > { %1834 = vmatpush3.bf16.msra.mxu0 %v1831_v48 }
 0x184   : > { %1836 = vmatprep.subr.bf16.mxu0 %v1835_v51 }
 0x187   : > { %1838 = vmatpush3.bf16.msra.mxu0 %v1835_v51  ;;  %v1577_v51 = vld [vmem:[%s731_s30] ss:$0 sm:$0xff] }
 0x188   : > { %1840 = vmatprep.subr.bf16.mxu0 %v1839_v54 }
 0x18b   : > { %1842 = vmatpush3.bf16.msra.mxu0 %v1839_v54 }
 0x18c   : > { %1844 = vmatprep.subr.bf16.mxu0 %v1843_v57 }
 0x18f   : > { %1846 = vmatpush3.bf16.msra.mxu0 %v1843_v57 }
 0x24d   : > { %v2652_v19 = vpop.f32.mrb[0].mxu0  ;;  %v1713_v20 = vpop.f32.mrb[0].mxu1 }
 0x24e   : > { %v990_v21 = vadd.f32 %v1713_v20, %v1572_v18  ;;  %v2654_v22 = vpop.f32.mrb[1].mxu0  ;;  %v984_v23 = vpop.f32.mrb[1].mxu1  ;;  %v1047_v20 = vld [vmem:[%s2580_s6] sm:$0xff] }
 0x24f   : > { %v985_v24 = vadd.f32 %v1572_v18, %v984_v23 }
 0x250   : > { %v996_v25 = vmul.f32 0.70710677, %v990_v21  ;;  %v994_v32 = vmul.f32 0.5, %v990_v21 }
 0x251   : > { %v995_v26 = vmul.f32 0.70710677, %v985_v24  ;;  %v993_v30 = vmul.f32 0.5, %v985_v24 }
 0x252   : > { %1949 = verf.f32 %v996_v25  ;;  %v1212_v25 = vld [vmem:[%s2587_s21 + $0x60] sm:$0xff] }
 0x253   : > { %1951 = verf.f32 %v995_v26  ;;  %v1213_v26 = vld [vmem:[%s2587_s21 + $0x68] sm:$0xff] }
 0x25c   : > { %v1950_v27 = vpop.eup %1949 }
 0x25d   : > { %v1952_v28 = vpop.eup %1951  ;;  %v1000_v29 = vadd.f32 1.0, %v1950_v27  ;;  %v1847_v27 = vpack.c.bf16 %v1213_v26, %v1212_v25 }
 0x25e   : > { %v999_v31 = vadd.f32 1.0, %v1952_v28  ;;  %v1214_v28 = vld [vmem:[%s2587_s21 + $0x70] sm:$0xff] }
 0x25f   : > { %v2661_v35 = vmul.f32 %v1000_v29, %v994_v32  ;;  %1848 = vmatprep.subr.bf16.mxu0 %v1847_v27  ;;  %v1215_v29 = vld [vmem:[%s2587_s21 + $0x78] sm:$0xff] }
 0x260   : > { %v2656_v33 = vmul.f32 %v999_v31, %v993_v30  ;;  %1850 = vmatpush3.bf16.msra.mxu0 %v1847_v27  ;;  %v1851_v30 = vpack.c.bf16 %v1215_v29, %v1214_v28  ;;  %v1571_v31 = vld [vmem:[%s717_s12] ss:$0 sm:$0xff] }
 0x261   : > { %v1012_v36 = vmul.f32 %v2661_v35, %v2661_v35  ;;  %v877_v32 = vadd.f32 %v1571_v31, %v2654_v22 }
 0x262   : > { %1005 = vadd.xlane.f32.xlu0 %v2656_v33  ;;  %v1011_v34 = vmul.f32 %v2656_v33, %v2656_v33  ;;  %1852 = vmatprep.subr.bf16.mxu0 %v1851_v30 }
 0x263   : > { %v885_v40 = vmul.f32 0.5, %v877_v32 }
 0x264   : > { %1013 = vadd.xlane.f32.xlu1 %v1011_v34  ;;  %1854 = vmatpush3.bf16.msra.mxu0 %v1851_v30  ;;  %v887_v34 = vmul.f32 0.70710677, %v877_v32 }
 0x266   : > { %1007 = vadd.xlane.f32.xlu0 %v2661_v35 }
 0x268   : > { %1015 = vadd.xlane.f32.xlu1 %v1012_v36 }
 0x27c   : > { %1051 = vperm.xlu0 %1944, %v1048_v38  }
 0x2ef   : > { %v1006_v58 = vpop.xlane.xlu0 %1005 }
 0x2f0   : > { %v1009_v59 = vmul.f32 0.015625, %v1006_v58 }
 0x2f1   : > { %v1014_v60 = vpop.xlane.xlu1 %1013 }
 0x2f2   : > { %v1019_v61 = vmul.f32 %v1009_v59, %v1009_v59  ;;  %v1017_v62 = vmul.f32 0.015625, %v1014_v60  ;;  %v1023_v10 = vsub.f32 %v2656_v33, %v1009_v59  ;;  %v882_v33 = vadd.f32 %v2652_v19, %v1571_v31 }
 0x2f3   : > { %v1008_v63 = vpop.xlane.xlu0 %1007 }
 0x2f4   : > { %v1021_v0 = vsub.f32 %v1017_v62, %v1019_v61  ;;  %v1010_v1 = vmul.f32 0.015625, %v1008_v63  ;;  %v886_v46 = vmul.f32 0.5, %v882_v33 }
 0x2f5   : > { %v1016_v4 = vpop.xlane.xlu1 %1015 }
 0x2f6   : > { %v1025_v5 = vadd.f32 1e-05, %v1021_v0  ;;  %v1020_v6 = vmul.f32 %v1010_v1, %v1010_v1  ;;  %v1018_v7 = vmul.f32 0.015625, %v1016_v4  ;;  %v1024_v15 = vsub.f32 %v2661_v35, %v1010_v1 }
 0x2f7   : > { %v888_v35 = vmul.f32 0.70710677, %v882_v33 }
 0x2f8   : > { %1953 = vrsqrt.f32 %v1025_v5  ;;  %v1022_v8 = vsub.f32 %v1018_v7, %v1020_v6 }
 0x2fa   : > { %v1026_v9 = vadd.f32 1e-05, %v1022_v8 }
 0x2fb   : > { %v1052_v39 = vpop.permute.xlu0 %1051 }
 0x2fc   : > { %1955 = vrsqrt.f32 %v1026_v9 }
 0x2fd   : > { %1957 = verf.f32 %v887_v34 }
 0x2fe   : > { %1959 = verf.f32 %v888_v35 }
 0x302   : > { %v1954_v11 = vpop.eup %1953 }
 0x303   : > { %v1029_v13 = vmul.f32 %v1954_v11, %v1023_v10 }
 0x305   : > { %v1037_v16 = vmul.f32 %v1573_v12, %v1029_v13 }
 0x306   : > { %v1956_v17 = vpop.eup %1955 }
 0x307   : > { %v1045_v18 = vadd.f32 %v1574_v14, %v1037_v16  ;;  %v1030_v21 = vmul.f32 %v1956_v17, %v1024_v15  ;;  %v1958_v36 = vpop.eup %1957 }
 0x308   : > { %v1960_v38 = vpop.eup %1959 }
 0x309   : > { %1715 = vmatpush3.msra.mxu1 %v1045_v18  ;;  %v1038_v23 = vmul.f32 %v1573_v12, %v1030_v21  ;;  %v892_v42 = vadd.f32 1.0, %v1960_v38 }
 0x30a   : > { %1717 = vmatmul.mubr.msk.f32.vlgmr.msra.gmra.mrb[2].mxu1 %vm1054_vm1, %v1047_v20  ;;  %1719 = vmatprep.subr.mxu1 %v2208_v37 }
 0x30b   : > { %v1046_v24 = vadd.f32 %v1574_v14, %v1038_v23  ;;  %1721 = vmatprep.mubr.msk.f32.mxu1 %vm2209_vm0, %v2208_v37  ;;  %v891_v37 = vadd.f32 1.0, %v1958_v36  ;;  %v894_v48 = vmul.f32 %v892_v42, %v886_v46 }
 0x30d   : > { %1720 = vmatpush3.msra.mxu1 %v1046_v24  ;;  %v893_v43 = vmul.f32 %v891_v37, %v885_v40 }
 0x30e   : > { %1722 = vmatmul.mubr.msk.f32.vlgmr.msra.gmra.mrb[4].mxu1 %vm1054_vm1, %v1047_v20 }
 0x3dd   : > { %v1124_v41 = vpop.f32.mrb[2].mxu1 }
 0x3de   : > { %v1125_v44 = vadd.f32 %v1124_v41, %v1052_v39  ;;  %v1718_v45 = vpop.f32.mrb[3].mxu1 }
 0x3e0   : > { %v1198_v47 = vmul.f32 %v1125_v44, %v893_v43 }
 0x3e1   : > { %v1194_v22 = vpop.f32.mrb[4].mxu1 }
 0x3e2   : > { %v1195_v19 = vadd.f32 %v1194_v22, %v1052_v39  ;;  %1756 = vmatprep.mubr.f32.mxu0 %v1198_v47  ;;  %v1723_v49 = vpop.f32.mrb[5].mxu1 }
 0x3e4   : > { %v1199_v50 = vmul.f32 %v1195_v19, %v894_v48 }
 0x3e6   : > { %1757 = vmatmul.mubr.f32.vlgmr.msra.gmra.mrb[2].mxu0 %v1199_v50 }
 0x4b9   : > { %v1758_v52 = vpop.f32.mrb[2].mxu0  ;;  %1305 = sbr.rel (%p1578_p0) target bundleno = 1224 (0x4c8), region = 100 }
 0x4ba   : > { %v1295_v53 = vadd.f32 %v1758_v52, %v1577_v51  ;;  %v1289_v54 = vpop.f32.mrb[3].mxu0 }
 0x4bb   : > { %v1290_v55 = vadd.f32 %v1577_v51, %v1289_v54 }
 0x4bc   : > { %v1299_v56 = vadd.f32 %v1295_v53, %v2598_v3 }
 0x4bd   : > { %v1298_v57 = vadd.f32 %v1290_v55, %v2596_v2 }
 0x4be   : > { %1301 = vst [vmem:[#allocation2 + $0x8] sm:$0xff] %v1299_v56 }
 0x4bf   : > { %1300 = vst [vmem:[#allocation2] sm:$0xff] %v1298_v57 }
 0x4c5   : > { %v1307_v59 = vld [vmem:[#allocation2 + $0x8] sm:$0xff] }
 0x4c6   : > { %v1306_v58 = vld [vmem:[#allocation2] sm:$0xff]  ;;  %1309 = vst [vmem:[#allocation12 + $0x8] sm:$0xff] %v1307_v59 }
 0x4c7   : > { %1308 = vst [vmem:[#allocation12] sm:$0xff] %v1306_v58 }
 0x4c8 PF: > { %p1886_p11 = scmp.eq.s32.totalorder %s2313_s14, 3  ;;  %s2211_s30 = smov [#allocation12]  }
 0x4c9   : > { %s1319_s20 = sshll.u32 %s2211_s30, 4  ;;  %s1320_s20 = int_to_ptr.vmem [resolvable:$true] %s1319_s20 }
 0x4ca   : > { %s2111_s19 = scalar_lea.vmem %s1320_s20, 256  ;;  %p2118_p7 = scmp.lt.s32.totalorder %s1320_s20, %s1320_s20 }
 0x4cb   : > { %p2112_p13 = scmp.ne.s32.totalorder %s1320_s20, %s2111_s19  ;;  %p2119_p8 = scmp.lt.s32.totalorder %s2111_s19, %s2111_s19 }
 0x4cd   : > { %p2113_p5 = pnand %p2112_p13, %p1886_p11  ;;  %p2120_p2 = por %p2119_p8, %p2118_p7 }
 0x4cf   : > { %p2114_p1 = pneg %p2113_p5 }
 0x4d1   : > { %p2121_p4 = pnand %p2120_p2, %p2114_p1 }
 0x4d3   : > { %2124 = shalt.err (!%p2121_p4)
}
 0x4d4   : > { %s2828_s22 = sld [smem:[#allocation32_spill]] }
 0x4da   : > { %s2125_s15 = scalar_lea.hbm %s2828_s22, 256 }
 0x4db   : > { %p2126_p6 = scmp.ne.s32.totalorder %s2828_s22, %s2125_s15  ;;  %p2131_p10 = scmp.lt.u32.totalorder %s2125_s15, %s2828_s22 }
 0x4dd   : > { %p2127_p12 = pnand %p2126_p6, %p1886_p11 }
 0x4df   : > { %p2128_p3 = pneg %p2127_p12 }
 0x4e1   : > { %p2133_p9 = pnand %p2131_p10, %p2128_p3 }
 0x4e3   : > { %2136 = shalt.err (!%p2133_p9)
}
 0x4e4   : > { %s2212_s24 = smov 128   ;;  %s2213_s25 = smov 8  }
 0x4e5   : > { %1866 = dma.vmem_to_hbm [thread:$0]  (%p1886_p11), %s1320_s20, 256, %s2828_s22, [#allocation5], %s2212_s24, %s2212_s24, %s2213_s25  }
 0x4e6   : > { %2174 = dma.done.wait (%p1886_p11), [#allocation5], 256  }
 0x4e7   : > { %2176 = vsyncadd (%p1886_p11), [#allocation5], 4294967040 }
 0x4e8 PF: > { %s2829_s18 = sld [smem:[#allocation19_spill]]  ;;  %s2830_s11 = sld [smem:[#allocation17_spill]] }
 0x4e9   : > { %s2831_s27 = sld [smem:[#allocation21_spill]]  ;;  %s2832_s28 = sld [smem:[#allocation18_spill]] }
 0x4ea   : > { %s2833_s29 = sld [smem:[#allocation20_spill]]  ;;  %s2834_s25 = smov %s2183_s26 }
 0x4ee   : > { %s33_s30 = sadd.s32 1, %s2829_s18   ;;  %s2835_s26 = smov %s2830_s11 }
 0x4ef   : > { %p30_p0 = scmp.ge.s32.totalorder %s33_s30, 6  }
 0x4f1   :  { %32 = sbr.rel (!%p30_p0) target bundleno = 21 (0x15), region = 190 }
 0x4f8   :  { %1335 = vsyncpa [#allocation4], 1 }
 0x4f9   :  { %1337 = vsyncpa [#allocation4 + $0x1], 1 }
 0x4fa   :  { %1338 = vsyncpa [#allocation7], 1 }
 0x4fb   :  { %1340 = vsyncpa [#allocation7 + $0x1], 1 }
 0x4fc   :  { %1341 = vsyncpa [#allocation10], 1 }
 0x4fd   :  { %1343 = vsyncpa [#allocation10 + $0x1], 1 }
 0x4fe   :  { %1344 = vsyncpa [#allocation5], 1 }
 0x4ff   :  { %1346 = vsyncpa [#allocation5 + $0x1], 1 }

</bundles_post_ra>
